<compile_context>
chip_gen: v7x
topology: tpu7x:2x2x1
jax: 0.10.0
libtpu: 0.0.40
codegen_flags: <defaults>
</compile_context>

<pallas_src>
import functools

import jax
import jax.numpy as jnp
from jax.experimental import pallas as pl
from jax.experimental.pallas import tpu as pltpu


LANE = 128


def _round_up(x, m):
    return (x + m - 1) // m * m


def _proj_ln_kernel(xcol_ref, w_ref, g_ref, b_ref, o_ref, *, c_real):
    """Fused patch-projection (im2col matmul) + LayerNorm for one token tile.

    xcol_ref: (T_tile, K)      bf16  im2col'd input patches (K = kh*kw*Cin)
    w_ref:    (K, C_pad)       bf16  folded conv weight, zero-padded to 128 lanes
    g_ref:    (1, C_pad)       f32   LayerNorm gamma (zero in pad lanes)
    b_ref:    (1, C_pad)       f32   LayerNorm beta  (zero in pad lanes)
    o_ref:    (T_tile, C_pad)  f32   output tokens (lane-dense)
    """
    # One MXU matmul with the 3x3 taps folded into the contraction dim.
    acc = jnp.dot(xcol_ref[...], w_ref[...],
                  preferred_element_type=jnp.float32)        # (T, C_pad) f32

    # LayerNorm over the real channels. The padded lanes of `acc` are exactly
    # zero (weights are zero-padded), so full-lane sums equal sums over the
    # real channels; one-pass sufficient statistics, biased var, eps = 1e-5.
    inv_c = 1.0 / c_real
    mean = jnp.sum(acc, axis=-1, keepdims=True) * inv_c
    msq = jnp.sum(acc * acc, axis=-1, keepdims=True) * inv_c
    var = jnp.maximum(msq - mean * mean, 0.0)
    y = (acc - mean) * jax.lax.rsqrt(var + 1e-5)
    # gamma/beta are zero in the padded lanes -> padded output lanes stay 0.
    o_ref[...] = y * g_ref[...] + b_ref[...]


def overlap_patch_embed(x_nchw, w_oihw, gamma, beta, *, stride=2,
                        tile_tokens=256):
    """OverlapPatchEmbed forward.

    x_nchw: (N, Cin, H, W) f32 input (PyTorch layout).
    w_oihw: (Cout, Cin, kh, kw) conv weight (bias=False).
    gamma, beta: (Cout,) LayerNorm affine params.
    Returns (tokens, Ho, Wo) with tokens of shape (N, Ho*Wo, Cout).
    """
    N, Cin, H, W = x_nchw.shape
    Cout, _, kh, kw = w_oihw.shape
    ph, pw = kh // 2, kw // 2
    Ho = (H + 2 * ph - kh) // stride + 1
    Wo = (W + 2 * pw - kw) // stride + 1

    # ---- glue: NCHW -> NHWC, pad, im2col via strided slices (data movement).
    x = jnp.transpose(x_nchw, (0, 2, 3, 1))
    xp = jnp.pad(x, ((0, 0), (ph, ph), (pw, pw), (0, 0)))
    taps = []
    for ky in range(kh):
        for kx in range(kw):
            taps.append(jax.lax.slice(
                xp,
                (0, ky, kx, 0),
                (N, ky + (Ho - 1) * stride + 1,
                 kx + (Wo - 1) * stride + 1, Cin),
                (1, stride, stride, 1)))                      # (N, Ho, Wo, Cin)
    K = kh * kw * Cin
    xcol = jnp.concatenate(taps, axis=-1).reshape(N * Ho * Wo, K)
    xcol = xcol.astype(jnp.bfloat16)

    # Folded weights (kh, kw, Cin, Cout) -> (K, Cout), lane-padded to 128.
    c_pad = _round_up(Cout, LANE)
    w_col = jnp.transpose(w_oihw, (2, 3, 1, 0)).reshape(K, Cout)
    w_col = jnp.pad(w_col, ((0, 0), (0, c_pad - Cout))).astype(jnp.bfloat16)
    g = jnp.pad(gamma.astype(jnp.float32), (0, c_pad - Cout)).reshape(1, c_pad)
    b = jnp.pad(beta.astype(jnp.float32), (0, c_pad - Cout)).reshape(1, c_pad)

    # Token tiling (grid -> BlockSpec double-buffered pipeline).
    T = N * Ho * Wo
    tile = min(tile_tokens, _round_up(T, 8))
    t_pad = _round_up(T, tile)
    if t_pad != T:
        xcol = jnp.pad(xcol, ((0, t_pad - T), (0, 0)))
    n_tiles = t_pad // tile

    kernel = functools.partial(_proj_ln_kernel, c_real=Cout)
    out = pl.pallas_call(
        kernel,
        out_shape=jax.ShapeDtypeStruct((t_pad, c_pad), jnp.float32),
        grid_spec=pltpu.PrefetchScalarGridSpec(
            num_scalar_prefetch=0,
            grid=(n_tiles,),
            in_specs=[
                pl.BlockSpec((tile, K), lambda i: (i, 0)),     # token tile
                pl.BlockSpec((K, c_pad), lambda i: (0, 0)),    # resident weights
                pl.BlockSpec((1, c_pad), lambda i: (0, 0)),    # gamma
                pl.BlockSpec((1, c_pad), lambda i: (0, 0)),    # beta
            ],
            out_specs=pl.BlockSpec((tile, c_pad), lambda i: (i, 0)),
        ),
        compiler_params=pltpu.CompilerParams(
            dimension_semantics=("parallel",),
            vmem_limit_bytes=48 * 1024 * 1024,
        ),
    )(xcol, w_col, g, b)

    tokens = out[:T, :Cout].reshape(N, Ho * Wo, Cout)
    return tokens, Ho, Wo


def init_overlap_patch_embed_params(key, in_chans, embed_dim, patch_size=3):
    """Deterministic params matching the PyTorch module's init scheme."""
    fan_out = patch_size * patch_size * embed_dim
    std = (2.0 / fan_out) ** 0.5
    w = std * jax.random.normal(
        key, (embed_dim, in_chans, patch_size, patch_size), jnp.float32)
    gamma = jnp.ones((embed_dim,), jnp.float32)
    beta = jnp.zeros((embed_dim,), jnp.float32)
    return {"w": w, "gamma": gamma, "beta": beta}


def _reference(x_nchw, w_oihw, gamma, beta, *, stride=2, cast_bf16=False):
    """Pure-JAX reference (matches the PyTorch forward)."""
    if cast_bf16:
        x_nchw = x_nchw.astype(jnp.bfloat16).astype(jnp.float32)
        w_oihw = w_oihw.astype(jnp.bfloat16).astype(jnp.float32)
    kh, kw = w_oihw.shape[2], w_oihw.shape[3]
    y = jax.lax.conv_general_dilated(
        x_nchw, w_oihw, window_strides=(stride, stride),
        padding=((kh // 2, kh // 2), (kw // 2, kw // 2)),
        dimension_numbers=("NCHW", "OIHW", "NCHW"))
    N, C, Ho, Wo = y.shape
    t = jnp.transpose(y.reshape(N, C, Ho * Wo), (0, 2, 1))     # (N, HW, C)
    mean = jnp.mean(t, axis=-1, keepdims=True)
    var = jnp.mean((t - mean) ** 2, axis=-1, keepdims=True)
    t = (t - mean) * jax.lax.rsqrt(var + 1e-5)
    t = t * gamma.reshape(1, 1, -1) + beta.reshape(1, 1, -1)
    return t, Ho, Wo


if __name__ == "__main__":
    key = jax.random.PRNGKey(0)
    kx1, kx2, kp = jax.random.split(key, 3)

    N, Cin, embed_dim = 2, 4, 16
    params = init_overlap_patch_embed_params(kp, Cin, embed_dim)
    fwd = jax.jit(functools.partial(overlap_patch_embed, stride=2,
                                    tile_tokens=256))

    def check(x):
        out, ho, wo = fwd(x, params["w"], params["gamma"], params["beta"])
        out = jax.block_until_ready(out)
        h_in, w_in = x.shape[2], x.shape[3]
        assert (ho, wo) == ((h_in + 1) // 2, (w_in + 1) // 2), (ho, wo)
        assert out.shape == (x.shape[0], ho * wo, embed_dim), out.shape
        # Strict check vs a bf16-input-consistent reference (MXU bf16 matmul
        # with f32 accumulation matches this to summation-order noise).
        ref_bf16, _, _ = _reference(x, params["w"], params["gamma"],
                                    params["beta"], cast_bf16=True)
        if not jnp.allclose(out, ref_bf16, atol=1e-3, rtol=1e-3):
            raise AssertionError("Pallas OverlapPatchEmbed mismatch (strict)")
        # Loose check vs the full-f32 reference (bounds bf16 input rounding).
        ref_f32, _, _ = _reference(x, params["w"], params["gamma"],
                                   params["beta"], cast_bf16=False)
        if not jnp.allclose(out, ref_f32, atol=1e-1, rtol=1e-1):
            raise AssertionError("Pallas OverlapPatchEmbed mismatch (loose)")

    # Small shape (grid of 1 token tile).
    check(jax.random.normal(kx1, (N, Cin, 16, 16), jnp.float32))
    # Larger shape exercising a multi-step grid (512 tokens / 256-token tiles).
    check(jax.random.normal(kx2, (N, Cin, 32, 32), jnp.float32))

    print("KERNEL_OK")
</pallas_src>

<mosaic_0001>
module attributes {stable_mosaic.version = 11 : i64} {
  func.func @_proj_ln_kernel(%arg0: i32, %arg1: memref<128x36xbf16, #tpu.memory_space<vmem>>, %arg2: memref<36x128xbf16, #tpu.memory_space<vmem>>, %arg3: memref<1x128xf32, #tpu.memory_space<vmem>>, %arg4: memref<1x128xf32, #tpu.memory_space<vmem>>, %arg5: memref<128x128xf32, #tpu.memory_space<vmem>>) attributes {dimension_semantics = [#tpu.dimension_semantics<parallel>], iteration_bounds = array<i64: 1>, scalar_prefetch = 0 : i64, scratch_operands = 0 : i64, tpu.core_type = #tpu.core_type<tc>, window_params = [{transform_indices = @transform_0, window_bounds = array<i64: 128, 36>}, {pipeline_mode = #tpu.pipeline_mode<synchronous>, transform_indices = @transform_1, window_bounds = array<i64: 36, 128>}, {pipeline_mode = #tpu.pipeline_mode<synchronous>, transform_indices = @transform_2, window_bounds = array<i64: 1, 128>}, {pipeline_mode = #tpu.pipeline_mode<synchronous>, transform_indices = @transform_3, window_bounds = array<i64: 1, 128>}, {transform_indices = @transform_4, window_bounds = array<i64: 128, 128>}]} {
    %c0 = arith.constant 0 : index
    %c0_0 = arith.constant 0 : index
    %0 = vector.load %arg1[%c0, %c0_0] : memref<128x36xbf16, #tpu.memory_space<vmem>>, vector<128x36xbf16>
    %c0_1 = arith.constant 0 : index
    %c0_2 = arith.constant 0 : index
    %1 = vector.load %arg2[%c0_1, %c0_2] : memref<36x128xbf16, #tpu.memory_space<vmem>>, vector<36x128xbf16>
    %cst = arith.constant dense<0.000000e+00> : vector<128x128xf32>
    %2 = tpu.matmul %0, %1, %cst {dimension_numbers = #tpu.dot_dimension_numbers<[1], [0], [0], [1], [0, 0, 1, 1], [], []>} : vector<128x36xbf16>, vector<36x128xbf16>, vector<128x128xf32> -> vector<128x128xf32>
    %cst_3 = arith.constant dense<0.000000e+00> : vector<128xf32>
    %3 = vector.multi_reduction <add>, %2, %cst_3 [1] : vector<128x128xf32> to vector<128xf32>
    %4 = vector.shape_cast %3 : vector<128xf32> to vector<128x1xf32>
    %cst_4 = arith.constant 6.250000e-02 : f32
    %5 = vector.broadcast %cst_4 : f32 to vector<128x1xf32>
    %6 = arith.mulf %4, %5 : vector<128x1xf32>
    %7 = arith.mulf %2, %2 : vector<128x128xf32>
    %cst_5 = arith.constant dense<0.000000e+00> : vector<128xf32>
    %8 = vector.multi_reduction <add>, %7, %cst_5 [1] : vector<128x128xf32> to vector<128xf32>
    %9 = vector.shape_cast %8 : vector<128xf32> to vector<128x1xf32>
    %cst_6 = arith.constant 6.250000e-02 : f32
    %10 = vector.broadcast %cst_6 : f32 to vector<128x1xf32>
    %11 = arith.mulf %9, %10 : vector<128x1xf32>
    %12 = arith.mulf %6, %6 : vector<128x1xf32>
    %13 = arith.subf %11, %12 : vector<128x1xf32>
    %cst_7 = arith.constant 0.000000e+00 : f32
    %14 = vector.broadcast %cst_7 : f32 to vector<128x1xf32>
    %15 = arith.maximumf %13, %14 : vector<128x1xf32>
    %16 = vector.broadcast %6 : vector<128x1xf32> to vector<128x128xf32>
    %17 = arith.subf %2, %16 : vector<128x128xf32>
    %cst_8 = arith.constant 9.99999974E-6 : f32
    %18 = vector.broadcast %cst_8 : f32 to vector<128x1xf32>
    %19 = arith.addf %15, %18 : vector<128x1xf32>
    %20 = math.rsqrt %19 : vector<128x1xf32>
    %21 = vector.broadcast %20 : vector<128x1xf32> to vector<128x128xf32>
    %22 = arith.mulf %17, %21 : vector<128x128xf32>
    %c0_9 = arith.constant 0 : index
    %c0_10 = arith.constant 0 : index
    %23 = vector.load %arg3[%c0_9, %c0_10] : memref<1x128xf32, #tpu.memory_space<vmem>>, vector<1x128xf32>
    %24 = vector.broadcast %23 : vector<1x128xf32> to vector<128x128xf32>
    %25 = arith.mulf %22, %24 : vector<128x128xf32>
    %c0_11 = arith.constant 0 : index
    %c0_12 = arith.constant 0 : index
    %26 = vector.load %arg4[%c0_11, %c0_12] : memref<1x128xf32, #tpu.memory_space<vmem>>, vector<1x128xf32>
    %27 = vector.broadcast %26 : vector<1x128xf32> to vector<128x128xf32>
    %28 = arith.addf %25, %27 : vector<128x128xf32>
    %c0_13 = arith.constant 0 : index
    %c0_14 = arith.constant 0 : index
    %29 = vector.load %arg5[%c0_13, %c0_14] : memref<128x128xf32, #tpu.memory_space<vmem>>, vector<128x128xf32>
    tpu.vector_store %arg5[%c0_13, %c0_14], %28 {strides = array<i32>} : memref<128x128xf32, #tpu.memory_space<vmem>>, vector<128x128xf32>,
    return
  }
  func.func @transform_0(%arg0: i32) -> (i32, i32) {
    %c0_i32 = arith.constant 0 : i32
    %c0_i32_0 = arith.constant 0 : i32
    return %arg0, %c0_i32 : i32, i32
  }
  func.func @transform_1(%arg0: i32) -> (i32, i32) {
    %c0_i32 = arith.constant 0 : i32
    %c0_i32_0 = arith.constant 0 : i32
    %c0_i32_1 = arith.constant 0 : i32
    return %c0_i32, %c0_i32_0 : i32, i32
  }
  func.func @transform_2(%arg0: i32) -> (i32, i32) {
    %c0_i32 = arith.constant 0 : i32
    %c0_i32_0 = arith.constant 0 : i32
    %c0_i32_1 = arith.constant 0 : i32
    return %c0_i32, %c0_i32_0 : i32, i32
  }
  func.func @transform_3(%arg0: i32) -> (i32, i32) {
    %c0_i32 = arith.constant 0 : i32
    %c0_i32_0 = arith.constant 0 : i32
    %c0_i32_1 = arith.constant 0 : i32
    return %c0_i32, %c0_i32_0 : i32, i32
  }
  func.func @transform_4(%arg0: i32) -> (i32, i32) {
    %c0_i32 = arith.constant 0 : i32
    %c0_i32_0 = arith.constant 0 : i32
    return %arg0, %c0_i32 : i32, i32
  }
}

</mosaic_0001>

<bundles_post_ra>
// kernel: overlap_patch_embed.1
= control target key start
LH: loop header
LB: loop body
LE: loop exit
PB: predicated region body
PF: predicated region fallthrough
CT: control target
= control target key end

     0   :  { %vm94_vm0 = vcmask 293888   ;;  %vm119_vm1 = vcmask 1041408   ;;  %s953_s1 = inlined_call_operand.vmem [shape: bf16[36,128], index: 1, kind: input, shape index: {}]   ;;  %s954_s0 = inlined_call_operand.vmem [shape: bf16[128,36], index: 0, kind: input, shape index: {}]   ;;  %s955_s2 = inlined_call_operand.vmem [shape: f32[1,128], index: 2, kind: input, shape index: {}]   ;;  %s956_s3 = inlined_call_operand.vmem [shape: f32[1,128], index: 3, kind: input, shape index: {}]   ;;  %s957_s4 = inlined_call_operand.vmem [shape: f32[128,128], index: 4, kind: output, shape index: {}]  }
   0x1   :  { %v572_v0 = vld [vmem:[%s953_s1] sm:$0xff]   ;;  %v573_v1 = vld [vmem:[%s953_s1 + $0x8] sm:$0xff]   ;;  %v574_v2 = vld [vmem:[%s953_s1 + $0x10] ss:$0 sps:$4 sm:$0x33]  }
   0x2   :  { %542 = vmatprep.subr.bf16.mxu0 %v572_v0  ;;  %564 = vmatprep.subr.bf16.mxu1 %v572_v0  ;;  %v575_v3 = vld [vmem:[%s954_s0] sm:$0xff]   ;;  %v121_v5 = vsel %vm119_vm1, %v574_v2, 0  ;;  %v577_v6 = vld [vmem:[%s954_s0 + $0x8] sm:$0xff]   ;;  %v579_v8 = vld [vmem:[%s954_s0 + $0x10] sm:$0xff]  }
   0x3   :  { %543 = vmatpush3.bf16.msra.mxu0 %v572_v0  ;;  %567 = vmatpush3.bf16.msra.mxu1 %v572_v0  ;;  %v576_v4 = vld [vmem:[%s954_s0 + $0x20] sm:$0xff]   ;;  %v578_v7 = vld [vmem:[%s954_s0 + $0x28] sm:$0xff]   ;;  %v581_v9 = vld [vmem:[%s954_s0 + $0x30] sm:$0xff]  }
   0x4   :  { %544 = vmatprep.subr.bf16.mxu0 %v573_v1  ;;  %565 = vmatprep.subr.bf16.mxu1 %v573_v1  ;;  %v580_v10 = vld [vmem:[%s954_s0 + $0x18] sm:$0xff]  }
   0x5   :  { %548 = vmatprep.mubr.msk.bf16.mxu0 %vm94_vm0, %v575_v3  ;;  %556 = vmatprep.mubr.msk.bf16.mxu1 %vm94_vm0, %v576_v4  ;;  %v582_v11 = vld [vmem:[%s954_s0 + $0x38] sm:$0xff]  }
   0x7   :  { %545 = vmatpush3.bf16.msra.mxu0 %v573_v1  ;;  %568 = vmatpush3.bf16.msra.mxu1 %v573_v1 }
   0x8   :  { %570 = vmatprep.subr.msk.bf16.mxu0 %vm119_vm1, %v574_v2  ;;  %571 = vmatprep.subr.msk.bf16.mxu1 %vm119_vm1, %v574_v2 }
   0xb   :  { %547 = vmatpush3.bf16.msra.mxu0 %v121_v5  ;;  %569 = vmatpush3.bf16.msra.mxu1 %v121_v5 }
   0xe   :  { %549 = vmatmul.mubr.msk.bf16.vlgmr.msra.gmra.mrb[0].mxu0 %vm94_vm0, %v577_v6  ;;  %557 = vmatmul.mubr.msk.bf16.vlgmr.msra.gmra.mrb[0].mxu1 %vm94_vm0, %v578_v7 }
   0xf   :  { %552 = vmatprep.mubr.msk.bf16.mxu0 %vm94_vm0, %v579_v8  ;;  %560 = vmatprep.mubr.msk.bf16.mxu1 %vm94_vm0, %v581_v9 }
  0x16   :  { %553 = vmatmul.mubr.msk.bf16.gmra.mrb[4].mxu0 %vm94_vm0, %v580_v10  ;;  %561 = vmatmul.mubr.msk.bf16.gmra.mrb[4].mxu1 %vm94_vm0, %v582_v11 }
  0xe1   :  { %v681_v12 = vpop.f32.mrb[0].mxu0  ;;  %v683_v13 = vpop.f32.mrb[0].mxu1 }
  0xe2   :  { %240 = vadd.xlane.f32.xlu0 %v683_v13  ;;  %v686_v14 = vpop.f32.mrb[1].mxu1  ;;  %224 = vadd.xlane.f32.xlu1 %v681_v12  ;;  %v689_v15 = vpop.f32.mrb[1].mxu0  ;;  %v270_v26 = vmul.f32 %v681_v12, %v681_v12  ;;  %v278_v29 = vmul.f32 %v683_v13, %v683_v13 }
  0xe3   :  { %v691_v16 = vpop.f32.mrb[2].mxu0  ;;  %v693_v17 = vpop.f32.mrb[2].mxu1  ;;  %v268_v32 = vmul.f32 %v689_v15, %v689_v15  ;;  %v276_v34 = vmul.f32 %v686_v14, %v686_v14 }
  0xe4   :  { %v695_v18 = vpop.f32.mrb[3].mxu0  ;;  %v697_v19 = vpop.f32.mrb[3].mxu1  ;;  %v271_v30 = vmul.f32 %v691_v16, %v691_v16  ;;  %v279_v31 = vmul.f32 %v693_v17, %v693_v17 }
  0xe5   :  { %v269_v33 = vmul.f32 %v695_v18, %v695_v18  ;;  %v277_v35 = vmul.f32 %v697_v19, %v697_v19 }
  0xe6   :  { %220 = vadd.xlane.f32.xlu0 %v689_v15  ;;  %226 = vadd.xlane.f32.xlu1 %v691_v16 }
  0xe9   :  { %v701_v20 = vpop.f32.mrb[4].mxu0  ;;  %v703_v21 = vpop.f32.mrb[4].mxu1 }
  0xea   :  { %236 = vadd.xlane.f32.xlu0 %v686_v14  ;;  %242 = vadd.xlane.f32.xlu1 %v693_v17  ;;  %v707_v22 = vpop.f32.mrb[5].mxu0  ;;  %v709_v23 = vpop.f32.mrb[5].mxu1  ;;  %v274_v36 = vmul.f32 %v701_v20, %v701_v20  ;;  %v282_v42 = vmul.f32 %v703_v21, %v703_v21 }
  0xeb   :  { %v711_v24 = vpop.f32.mrb[6].mxu0  ;;  %v713_v25 = vpop.f32.mrb[6].mxu1  ;;  %v272_v38 = vmul.f32 %v707_v22, %v707_v22  ;;  %v280_v40 = vmul.f32 %v709_v23, %v709_v23 }
  0xec   :  { %v717_v27 = vpop.f32.mrb[7].mxu0  ;;  %v719_v28 = vpop.f32.mrb[7].mxu1  ;;  %v275_v37 = vmul.f32 %v711_v24, %v711_v24  ;;  %v283_v43 = vmul.f32 %v713_v25, %v713_v25 }
  0xed   :  { %v273_v39 = vmul.f32 %v717_v27, %v717_v27  ;;  %v281_v41 = vmul.f32 %v719_v28, %v719_v28 }
  0xee   :  { %288 = vadd.xlane.f32.xlu0 %v270_v26  ;;  %238 = vadd.xlane.f32.xlu1 %v697_v19 }
  0xf2   :  { %304 = vadd.xlane.f32.xlu0 %v278_v29  ;;  %290 = vadd.xlane.f32.xlu1 %v271_v30 }
  0xf6   :  { %306 = vadd.xlane.f32.xlu1 %v279_v31  ;;  %222 = vadd.xlane.f32.xlu0 %v695_v18 }
  0xfa   :  { %284 = vadd.xlane.f32.xlu0 %v268_v32  ;;  %286 = vadd.xlane.f32.xlu1 %v269_v33 }
  0xfe   :  { %300 = vadd.xlane.f32.xlu0 %v276_v34  ;;  %302 = vadd.xlane.f32.xlu1 %v277_v35 }
 0x102   :  { %232 = vadd.xlane.f32.xlu0 %v701_v20  ;;  %234 = vadd.xlane.f32.xlu1 %v711_v24 }
 0x106   :  { %248 = vadd.xlane.f32.xlu0 %v703_v21  ;;  %250 = vadd.xlane.f32.xlu1 %v713_v25 }
 0x10a   :  { %228 = vadd.xlane.f32.xlu0 %v707_v22  ;;  %230 = vadd.xlane.f32.xlu1 %v717_v27 }
 0x10e   :  { %244 = vadd.xlane.f32.xlu0 %v709_v23  ;;  %246 = vadd.xlane.f32.xlu1 %v719_v28 }
 0x112   :  { %296 = vadd.xlane.f32.xlu0 %v274_v36  ;;  %298 = vadd.xlane.f32.xlu1 %v275_v37 }
 0x116   :  { %292 = vadd.xlane.f32.xlu0 %v272_v38  ;;  %294 = vadd.xlane.f32.xlu1 %v273_v39 }
 0x11a   :  { %308 = vadd.xlane.f32.xlu0 %v280_v40  ;;  %310 = vadd.xlane.f32.xlu1 %v281_v41 }
 0x11e   :  { %312 = vadd.xlane.f32.xlu0 %v282_v42  ;;  %314 = vadd.xlane.f32.xlu1 %v283_v43 }
 0x16f   :  { %v241_v44 = vpop.xlane.xlu0 %240  ;;  %v225_v45 = vpop.xlane.xlu1 %224 }
 0x170   :  { %v761_v50 = vmul.f32 0.0625, %v225_v45  ;;  %v763_v51 = vmul.f32 0.0625, %v241_v44 }
 0x172   :  { %v334_v54 = vmul.f32 %v761_v50, %v761_v50  ;;  %v342_v58 = vmul.f32 %v763_v51, %v763_v51 }
 0x173   :  { %v221_v46 = vpop.xlane.xlu0 %220  ;;  %v227_v47 = vpop.xlane.xlu1 %226 }
 0x174   :  { %v767_v55 = vmul.f32 0.0625, %v227_v47  ;;  %v775_v5 = vmul.f32 0.0625, %v221_v46 }
 0x176   :  { %v335_v62 = vmul.f32 %v767_v55, %v767_v55  ;;  %v332_v32 = vmul.f32 %v775_v5, %v775_v5 }
 0x177   :  { %v237_v48 = vpop.xlane.xlu0 %236  ;;  %v243_v49 = vpop.xlane.xlu1 %242 }
 0x178   :  { %v771_v59 = vmul.f32 0.0625, %v243_v49  ;;  %v783_v33 = vmul.f32 0.0625, %v237_v48 }
 0x17a   :  { %v343_v6 = vmul.f32 %v771_v59, %v771_v59  ;;  %v340_v44 = vmul.f32 %v783_v33, %v783_v33 }
 0x17b   :  { %v289_v52 = vpop.xlane.xlu0 %288  ;;  %v239_v53 = vpop.xlane.xlu1 %238 }
 0x17c   :  { %v318_v56 = vmul.f32 0.0625, %v289_v52  ;;  %v787_v40 = vmul.f32 0.0625, %v239_v53  ;;  %v382_v52 = vsub.f32 %v681_v12, %v761_v50  ;;  %v803_v12 = vld [vmem:[%s956_s3] ss:$0 sm:$0xff] }
 0x17e   :  { %v350_v57 = vsub.f32 %v318_v56, %v334_v54  ;;  %v341_v53 = vmul.f32 %v787_v40, %v787_v40 }
 0x17f   :  { %v305_v60 = vpop.xlane.xlu0 %304  ;;  %v291_v61 = vpop.xlane.xlu1 %290 }
 0x180   :  { %v366_v63 = vmax.f32 %v350_v57, 0.0  ;;  %v326_v0 = vmul.f32 0.0625, %v305_v60  ;;  %v319_v1 = vmul.f32 0.0625, %v291_v61  ;;  %v798_v57 = vld [vmem:[%s955_s2] ss:$0 sm:$0xff] }
 0x182   :  { %v398_v2 = vadd.f32 1e-05, %v366_v63  ;;  %v358_v3 = vsub.f32 %v326_v0, %v342_v58  ;;  %v351_v4 = vsub.f32 %v319_v1, %v335_v62 }
 0x183   :  { %v307_v7 = vpop.xlane.xlu1 %306  ;;  %v223_v8 = vpop.xlane.xlu0 %222 }
 0x184   :  { %583 = vrsqrt.f32 %v398_v2  ;;  %v374_v9 = vmax.f32 %v358_v3, 0.0  ;;  %v367_v10 = vmax.f32 %v351_v4, 0.0  ;;  %v327_v11 = vmul.f32 0.0625, %v307_v7 }
 0x185   :  { %v779_v26 = vmul.f32 0.0625, %v223_v8  ;;  %v390_v2 = vsub.f32 %v683_v13, %v763_v51  ;;  %v383_v7 = vsub.f32 %v691_v16, %v767_v55  ;;  %v391_v13 = vsub.f32 %v693_v17, %v771_v59 }
 0x186   :  { %v406_v29 = vadd.f32 1e-05, %v374_v9  ;;  %v399_v30 = vadd.f32 1e-05, %v367_v10  ;;  %v359_v31 = vsub.f32 %v327_v11, %v343_v6  ;;  %v380_v17 = vsub.f32 %v689_v15, %v775_v5 }
 0x187   :  { %v333_v34 = vmul.f32 %v779_v26, %v779_v26  ;;  %v285_v35 = vpop.xlane.xlu0 %284  ;;  %v287_v36 = vpop.xlane.xlu1 %286 }
 0x188   :  { %585 = vrsqrt.f32 %v406_v29  ;;  %v375_v37 = vmax.f32 %v359_v31, 0.0  ;;  %v316_v38 = vmul.f32 0.0625, %v285_v35  ;;  %v317_v39 = vmul.f32 0.0625, %v287_v36 }
 0x189   :  { %587 = vrsqrt.f32 %v399_v30 }
 0x18a   :  { %v407_v41 = vadd.f32 1e-05, %v375_v37  ;;  %v348_v42 = vsub.f32 %v316_v38, %v332_v32  ;;  %v349_v43 = vsub.f32 %v317_v39, %v333_v34 }
 0x18b   :  { %v301_v45 = vpop.xlane.xlu0 %300  ;;  %v303_v46 = vpop.xlane.xlu1 %302 }
 0x18c   :  { %589 = vrsqrt.f32 %v407_v41  ;;  %v364_v47 = vmax.f32 %v348_v42, 0.0  ;;  %v365_v48 = vmax.f32 %v349_v43, 0.0  ;;  %v324_v49 = vmul.f32 0.0625, %v301_v45 }
 0x18d   :  { %v325_v54 = vmul.f32 0.0625, %v303_v46  ;;  %v381_v41 = vsub.f32 %v695_v18, %v779_v26 }
 0x18e   :  { %v584_v56 = vpop.eup %583  ;;  %v396_v58 = vadd.f32 1e-05, %v364_v47  ;;  %v397_v60 = vadd.f32 1e-05, %v365_v48  ;;  %v356_v61 = vsub.f32 %v324_v49, %v340_v44  ;;  %v388_v48 = vsub.f32 %v686_v14, %v783_v33 }
 0x18f   :  { %v430_v62 = vmul.f32 %v584_v56, %v382_v52  ;;  %v357_v63 = vsub.f32 %v325_v54, %v341_v53  ;;  %v233_v0 = vpop.xlane.xlu0 %232  ;;  %v235_v1 = vpop.xlane.xlu1 %234  ;;  %v389_v49 = vsub.f32 %v697_v19, %v787_v40 }
 0x190   :  { %591 = vrsqrt.f32 %v396_v58  ;;  %v372_v50 = vmax.f32 %v356_v61, 0.0  ;;  %v835_v42 = vmul.f32 0.0625, %v233_v0  ;;  %v838_v5 = vmul.f32 0.0625, %v235_v1 }
 0x191   :  { %v453_v3 = vmul.f32 %v798_v57, %v430_v62  ;;  %593 = vrsqrt.f32 %v397_v60  ;;  %v373_v4 = vmax.f32 %v357_v63, 0.0 }
 0x192   :  { %v586_v6 = vpop.eup %585  ;;  %v404_v8 = vadd.f32 1e-05, %v372_v50  ;;  %v338_v53 = vmul.f32 %v835_v42, %v835_v42  ;;  %v339_v14 = vmul.f32 %v838_v5, %v838_v5 }
 0x193   :  { %v588_v9 = vpop.eup %587  ;;  %v476_v10 = vadd.f32 %v803_v12, %v453_v3  ;;  %v438_v11 = vmul.f32 %v586_v6, %v390_v2  ;;  %v405_v29 = vadd.f32 1e-05, %v373_v4  ;;  %v811_v30 = vpop.xlane.xlu0 %248 }
 0x194   :  { %v813_v31 = vpop.xlane.xlu1 %250  ;;  %v431_v32 = vmul.f32 %v588_v9, %v383_v7  ;;  %595 = vrsqrt.f32 %v404_v8 }
 0x195   :  { %492 = vst [vmem:[%s957_s4 + $0x10] sm:$0xff] %v476_v10  ;;  %v461_v16 = vmul.f32 %v798_v57, %v438_v11  ;;  %597 = vrsqrt.f32 %v405_v29 }
 0x196   :  { %v590_v51 = vpop.eup %589  ;;  %v454_v55 = vmul.f32 %v798_v57, %v431_v32 }
 0x197   :  { %v484_v34 = vadd.f32 %v803_v12, %v461_v16  ;;  %v439_v35 = vmul.f32 %v590_v51, %v391_v13  ;;  %v229_v36 = vpop.xlane.xlu0 %228 }
 0x198   :  { %v231_v37 = vpop.xlane.xlu1 %230  ;;  %v477_v38 = vadd.f32 %v803_v12, %v454_v55  ;;  %v854_v33 = vmul.f32 0.0625, %v229_v36  ;;  %v884_v36 = vmul.f32 0.0625, %v811_v30 }
 0x199   :  { %500 = vst [vmem:[%s957_s4 + $0x50] sm:$0xff] %v484_v34  ;;  %v462_v59 = vmul.f32 %v798_v57, %v439_v35  ;;  %v861_v1 = vmul.f32 0.0625, %v231_v37 }
 0x19a   :  { %v592_v39 = vpop.eup %591  ;;  %493 = vst [vmem:[%s957_s4 + $0x18] sm:$0xff] %v477_v38  ;;  %v336_v6 = vmul.f32 %v854_v33, %v854_v33 }
 0x19b   :  { %v594_v43 = vpop.eup %593  ;;  %v485_v44 = vadd.f32 %v803_v12, %v462_v59  ;;  %v428_v15 = vmul.f32 %v592_v39, %v380_v17  ;;  %v245_v45 = vpop.xlane.xlu0 %244  ;;  %v337_v16 = vmul.f32 %v861_v1, %v861_v1 }
 0x19c   :  { %v247_v46 = vpop.xlane.xlu1 %246  ;;  %v429_v47 = vmul.f32 %v594_v43, %v381_v41  ;;  %v870_v7 = vmul.f32 0.0625, %v245_v45 }
 0x19d   :  { %501 = vst [vmem:[%s957_s4 + $0x58] sm:$0xff] %v485_v44  ;;  %v451_v18 = vmul.f32 %v798_v57, %v428_v15  ;;  %v872_v8 = vmul.f32 0.0625, %v247_v46  ;;  %v891_v15 = vmul.f32 0.0625, %v813_v31 }
 0x19e   :  { %v596_v26 = vpop.eup %595  ;;  %v452_v52 = vmul.f32 %v798_v57, %v429_v47  ;;  %v344_v37 = vmul.f32 %v870_v7, %v870_v7 }
 0x19f   :  { %v598_v54 = vpop.eup %597  ;;  %v474_v56 = vadd.f32 %v803_v12, %v451_v18  ;;  %v436_v58 = vmul.f32 %v596_v26, %v388_v48  ;;  %v297_v60 = vpop.xlane.xlu0 %296  ;;  %v345_v38 = vmul.f32 %v872_v8, %v872_v8  ;;  %v346_v48 = vmul.f32 %v884_v36, %v884_v36 }
 0x1a0   :  { %v299_v61 = vpop.xlane.xlu1 %298  ;;  %v475_v62 = vadd.f32 %v803_v12, %v452_v52  ;;  %v437_v63 = vmul.f32 %v598_v54, %v389_v49  ;;  %v322_v19 = vmul.f32 0.0625, %v297_v60 }
 0x1a1   :  { %v323_v40 = vmul.f32 0.0625, %v299_v61  ;;  %490 = vst [vmem:[%s957_s4] sm:$0xff] %v474_v56  ;;  %v459_v0 = vmul.f32 %v798_v57, %v436_v58  ;;  %v347_v56 = vmul.f32 %v891_v15, %v891_v15 }
 0x1a2   :  { %491 = vst [vmem:[%s957_s4 + $0x8] sm:$0xff] %v475_v62  ;;  %v460_v50 = vmul.f32 %v798_v57, %v437_v63  ;;  %v354_v2 = vsub.f32 %v322_v19, %v338_v53  ;;  %v386_v63 = vsub.f32 %v701_v20, %v835_v42  ;;  %v385_v20 = vsub.f32 %v717_v27, %v861_v1 }
 0x1a3   :  { %v355_v3 = vsub.f32 %v323_v40, %v339_v14  ;;  %v482_v4 = vadd.f32 %v803_v12, %v459_v0  ;;  %v293_v9 = vpop.xlane.xlu0 %292  ;;  %v387_v0 = vsub.f32 %v711_v24, %v838_v5  ;;  %v393_v27 = vsub.f32 %v719_v28, %v872_v8 }
 0x1a4   :  { %v295_v10 = vpop.xlane.xlu1 %294  ;;  %v483_v11 = vadd.f32 %v803_v12, %v460_v50  ;;  %v370_v29 = vmax.f32 %v354_v2, 0.0  ;;  %v320_v13 = vmul.f32 0.0625, %v293_v9  ;;  %v384_v9 = vsub.f32 %v707_v22, %v854_v33 }
 0x1a5   :  { %v371_v32 = vmax.f32 %v355_v3, 0.0  ;;  %498 = vst [vmem:[%s957_s4 + $0x40] sm:$0xff] %v482_v4  ;;  %v321_v51 = vmul.f32 0.0625, %v295_v10 }
 0x1a6   :  { %499 = vst [vmem:[%s957_s4 + $0x48] sm:$0xff] %v483_v11  ;;  %v402_v55 = vadd.f32 1e-05, %v370_v29  ;;  %v352_v35 = vsub.f32 %v320_v13, %v336_v6 }
 0x1a7   :  { %v403_v34 = vadd.f32 1e-05, %v371_v32  ;;  %v353_v17 = vsub.f32 %v321_v51, %v337_v16  ;;  %v309_v59 = vpop.xlane.xlu0 %308  ;;  %v392_v16 = vsub.f32 %v709_v23, %v870_v7 }
 0x1a8   :  { %v311_v39 = vpop.xlane.xlu1 %310  ;;  %599 = vrsqrt.f32 %v402_v55  ;;  %v368_v41 = vmax.f32 %v352_v35, 0.0  ;;  %v328_v43 = vmul.f32 0.0625, %v309_v59  ;;  %v394_v35 = vsub.f32 %v703_v21, %v884_v36 }
 0x1a9   :  { %v329_v44 = vmul.f32 0.0625, %v311_v39  ;;  %601 = vrsqrt.f32 %v403_v34  ;;  %v369_v45 = vmax.f32 %v353_v17, 0.0 }
 0x1aa   :  { %v400_v30 = vadd.f32 1e-05, %v368_v41  ;;  %v360_v46 = vsub.f32 %v328_v43, %v344_v37  ;;  %v395_v37 = vsub.f32 %v713_v25, %v891_v15 }
 0x1ab   :  { %v361_v47 = vsub.f32 %v329_v44, %v345_v38  ;;  %v401_v18 = vadd.f32 1e-05, %v369_v45  ;;  %v313_v26 = vpop.xlane.xlu0 %312 }
 0x1ac   :  { %v315_v49 = vpop.xlane.xlu1 %314  ;;  %603 = vrsqrt.f32 %v400_v30  ;;  %v376_v52 = vmax.f32 %v360_v46, 0.0  ;;  %v330_v54 = vmul.f32 0.0625, %v313_v26 }
 0x1ad   :  { %v377_v53 = vmax.f32 %v361_v47, 0.0  ;;  %605 = vrsqrt.f32 %v401_v18  ;;  %v331_v31 = vmul.f32 0.0625, %v315_v49 }
 0x1ae   :  { %v408_v58 = vadd.f32 1e-05, %v376_v52  ;;  %v362_v60 = vsub.f32 %v330_v54, %v346_v48 }
 0x1af   :  { %v409_v14 = vadd.f32 1e-05, %v377_v53  ;;  %v363_v61 = vsub.f32 %v331_v31, %v347_v56 }
 0x1b0   :  { %607 = vrsqrt.f32 %v408_v58  ;;  %v378_v62 = vmax.f32 %v362_v60, 0.0 }
 0x1b1   :  { %609 = vrsqrt.f32 %v409_v14  ;;  %v379_v19 = vmax.f32 %v363_v61, 0.0 }
 0x1b2   :  { %v600_v40 = vpop.eup %599  ;;  %v410_v50 = vadd.f32 1e-05, %v378_v62 }
 0x1b3   :  { %v602_v2 = vpop.eup %601  ;;  %v434_v3 = vmul.f32 %v600_v40, %v386_v63  ;;  %v411_v4 = vadd.f32 1e-05, %v379_v19 }
 0x1b4   :  { %v435_v6 = vmul.f32 %v602_v2, %v387_v0  ;;  %611 = vrsqrt.f32 %v410_v50 }
 0x1b5   :  { %v457_v10 = vmul.f32 %v798_v57, %v434_v3  ;;  %613 = vrsqrt.f32 %v411_v4 }
 0x1b6   :  { %v604_v11 = vpop.eup %603  ;;  %v458_v42 = vmul.f32 %v798_v57, %v435_v6 }
 0x1b7   :  { %v606_v29 = vpop.eup %605  ;;  %v480_v24 = vadd.f32 %v803_v12, %v457_v10  ;;  %v432_v5 = vmul.f32 %v604_v11, %v384_v9 }
 0x1b8   :  { %v481_v32 = vadd.f32 %v803_v12, %v458_v42  ;;  %v433_v13 = vmul.f32 %v606_v29, %v385_v20 }
 0x1b9   :  { %496 = vst [vmem:[%s957_s4 + $0x30] sm:$0xff] %v480_v24  ;;  %v455_v22 = vmul.f32 %v798_v57, %v432_v5 }
 0x1ba   :  { %v608_v33 = vpop.eup %607  ;;  %497 = vst [vmem:[%s957_s4 + $0x38] sm:$0xff] %v481_v32  ;;  %v456_v1 = vmul.f32 %v798_v57, %v433_v13 }
 0x1bb   :  { %v610_v51 = vpop.eup %609  ;;  %v478_v55 = vadd.f32 %v803_v12, %v455_v22  ;;  %v440_v23 = vmul.f32 %v608_v33, %v392_v16 }
 0x1bc   :  { %v479_v7 = vadd.f32 %v803_v12, %v456_v1  ;;  %v441_v34 = vmul.f32 %v610_v51, %v393_v27 }
 0x1bd   :  { %494 = vst [vmem:[%s957_s4 + $0x20] sm:$0xff] %v478_v55  ;;  %v463_v28 = vmul.f32 %v798_v57, %v440_v23 }
 0x1be   :  { %v612_v8 = vpop.eup %611  ;;  %495 = vst [vmem:[%s957_s4 + $0x28] sm:$0xff] %v479_v7  ;;  %v464_v38 = vmul.f32 %v798_v57, %v441_v34 }
 0x1bf   :  { %v614_v17 = vpop.eup %613  ;;  %v486_v59 = vadd.f32 %v803_v12, %v463_v28  ;;  %v442_v21 = vmul.f32 %v612_v8, %v394_v35 }
 0x1c0   :  { %v487_v36 = vadd.f32 %v803_v12, %v464_v38  ;;  %v443_v39 = vmul.f32 %v614_v17, %v395_v37 }
 0x1c1   :  { %502 = vst [vmem:[%s957_s4 + $0x60] sm:$0xff] %v486_v59  ;;  %v465_v41 = vmul.f32 %v798_v57, %v442_v21 }
 0x1c2   :  { %503 = vst [vmem:[%s957_s4 + $0x68] sm:$0xff] %v487_v36  ;;  %v466_v25 = vmul.f32 %v798_v57, %v443_v39 }
 0x1c3   :  { %v488_v43 = vadd.f32 %v803_v12, %v465_v41 }
 0x1c4   :  { %v489_v44 = vadd.f32 %v803_v12, %v466_v25 }
 0x1c5   :  { %504 = vst [vmem:[%s957_s4 + $0x70] sm:$0xff] %v488_v43 }
 0x1c6   :  { %505 = vst [vmem:[%s957_s4 + $0x78] sm:$0xff] %v489_v44 }

</bundles_post_ra>
